<compile_context>
chip_gen: v5e
topology: v5e:2x2
jax: 0.10.0
libtpu: 0.0.40
codegen_flags: <defaults>
</compile_context>

<pallas_src>
import functools

import jax
import jax.numpy as jnp
from jax.experimental import pallas as pl
from jax.experimental.pallas import tpu as pltpu

_LANE = 128
_SUBLANE = 8
_TM_MAX = 1024  # rows of x per grid step


def _round_up(x, n):
    return ((x + n - 1) // n) * n


def _fc_kernel(x_ref, w_ref, b_ref, o_ref):
    # x_ref: (TM, K_pad)  w_ref: (K_pad, N_pad)  b_ref: (1, N_pad)  o_ref: (TM, N_pad)
    acc = jnp.dot(x_ref[...], w_ref[...], preferred_element_type=jnp.float32)
    o_ref[...] = (acc + b_ref[...]).astype(o_ref.dtype)


def prepare_fc_backbone_params(weight, bias):
    """One-time parameter preprocessing (keep OUT of the per-call path).

    weight: (seq_len, n_input)  PyTorch nn.Linear layout
    bias:   (seq_len,)
    returns (w_pad, b_pad) with
      w_pad: (K_pad, N_pad) = zero-padded weight.T  (K_pad, N_pad -> multiples of 128)
      b_pad: (1, N_pad)     = zero-padded bias
    Padded rows/cols are zero so the sliced output matches exactly.
    """
    seq_len, n_input = weight.shape
    k_pad = _round_up(n_input, _LANE)
    n_pad = _round_up(seq_len, _LANE)
    w_pad = jnp.zeros((k_pad, n_pad), weight.dtype).at[:n_input, :seq_len].set(weight.T)
    b_pad = jnp.zeros((1, n_pad), bias.dtype).at[0, :seq_len].set(bias)
    return w_pad, b_pad


def fc_backbone_forward(x, w_pad, b_pad, seq_len):
    """FCBackbone.forward: out = Linear(n_input -> seq_len)(x).

    x:      (..., n_input)   float32
    w_pad:  (K_pad, N_pad)   from prepare_fc_backbone_params
    b_pad:  (1, N_pad)       from prepare_fc_backbone_params
    returns (..., seq_len)   float32
    """
    *lead, n_input = x.shape
    k_pad, n_pad = w_pad.shape

    m = 1
    for d in lead:
        m *= d

    # Tile M: TM <= _TM_MAX, multiple of 8; pad M so the grid divides evenly.
    m8 = max(_round_up(m, _SUBLANE), _SUBLANE)
    tm = min(_TM_MAX, m8)
    m_pad = _round_up(m8, tm)
    grid_m = m_pad // tm

    x2d = x.reshape(m, n_input)
    # Single pad covers both the M-tiling remainder and the K lane padding.
    x_p = jnp.pad(x2d, ((0, m_pad - m), (0, k_pad - n_input)))

    itemsize = jnp.dtype(x.dtype).itemsize
    cost = pl.CostEstimate(
        flops=2 * m_pad * k_pad * n_pad,
        transcendentals=0,
        bytes_accessed=(x_p.size + w_pad.size + b_pad.size + m_pad * n_pad) * itemsize,
    )

    out = pl.pallas_call(
        _fc_kernel,
        out_shape=jax.ShapeDtypeStruct((m_pad, n_pad), x.dtype),
        grid_spec=pltpu.PrefetchScalarGridSpec(
            num_scalar_prefetch=0,
            grid=(grid_m,),
            in_specs=[
                pl.BlockSpec((tm, k_pad), lambda i: (i, 0)),
                pl.BlockSpec((k_pad, n_pad), lambda i: (0, 0)),  # VMEM-resident weight
                pl.BlockSpec((1, n_pad), lambda i: (0, 0)),      # VMEM-resident bias
            ],
            out_specs=pl.BlockSpec((tm, n_pad), lambda i: (i, 0)),
        ),
        compiler_params=pltpu.CompilerParams(
            dimension_semantics=("parallel",)),
        cost_estimate=cost,
    )(x_p, w_pad, b_pad)

    return out[:m, :seq_len].reshape(*lead, seq_len)


def init_fc_backbone_params(key, n_input=48, seq_len=80):
    """Deterministic init matching nn.Linear's shapes (kaiming-uniform-ish)."""
    kw, kb = jax.random.split(key)
    bound = 1.0 / (n_input ** 0.5)
    weight = jax.random.uniform(kw, (seq_len, n_input), jnp.float32,
                                minval=-bound, maxval=bound)
    bias = jax.random.uniform(kb, (seq_len,), jnp.float32,
                              minval=-bound, maxval=bound)
    return weight, bias


if __name__ == "__main__":
    n_input, seq_len = 48, 80
    batch, time = 2, 8

    key = jax.random.PRNGKey(0)
    kx, kp = jax.random.split(key)
    x = jax.random.normal(kx, (batch, time, n_input), jnp.float32)
    weight, bias = init_fc_backbone_params(kp, n_input=n_input, seq_len=seq_len)

    # One-time param prep (transpose + zero-pad), outside the per-call path.
    w_pad, b_pad = prepare_fc_backbone_params(weight, bias)
    w_pad, b_pad = jax.block_until_ready((w_pad, b_pad))

    fwd = jax.jit(functools.partial(fc_backbone_forward, seq_len=seq_len))
    out = fwd(x, w_pad, b_pad)
    out = jax.block_until_ready(out)

    # Reference check against plain JAX (same math as nn.Linear).
    ref = x @ weight.T + bias
    assert out.shape == (batch, time, seq_len), out.shape
    assert jnp.allclose(out, ref, atol=1e-4, rtol=1e-4), float(
        jnp.max(jnp.abs(out - ref)))

    print("KERNEL_OK")
</pallas_src>

<mosaic_0001>
module attributes {stable_mosaic.version = 11 : i64} {
  func.func @_fc_kernel(%arg0: i32, %arg1: memref<16x128xf32, #tpu.memory_space<vmem>>, %arg2: memref<128x128xf32, #tpu.memory_space<vmem>>, %arg3: memref<1x128xf32, #tpu.memory_space<vmem>>, %arg4: memref<16x128xf32, #tpu.memory_space<vmem>>) attributes {dimension_semantics = [#tpu.dimension_semantics<parallel>], iteration_bounds = array<i64: 1>, scalar_prefetch = 0 : i64, scratch_operands = 0 : i64, tpu.core_type = #tpu.core_type<tc>, window_params = [{transform_indices = @transform_0, window_bounds = array<i64: 16, 128>}, {pipeline_mode = #tpu.pipeline_mode<synchronous>, transform_indices = @transform_1, window_bounds = array<i64: 128, 128>}, {pipeline_mode = #tpu.pipeline_mode<synchronous>, transform_indices = @transform_2, window_bounds = array<i64: 1, 128>}, {transform_indices = @transform_3, window_bounds = array<i64: 16, 128>}]} {
    %c0 = arith.constant 0 : index
    %c0_0 = arith.constant 0 : index
    %0 = vector.load %arg1[%c0, %c0_0] : memref<16x128xf32, #tpu.memory_space<vmem>>, vector<16x128xf32>
    %c0_1 = arith.constant 0 : index
    %c0_2 = arith.constant 0 : index
    %1 = vector.load %arg2[%c0_1, %c0_2] : memref<128x128xf32, #tpu.memory_space<vmem>>, vector<128x128xf32>
    %cst = arith.constant dense<0.000000e+00> : vector<16x128xf32>
    %2 = tpu.matmul %0, %1, %cst {dimension_numbers = #tpu.dot_dimension_numbers<[1], [0], [0], [1], [0, 0, 1, 1], [], []>} : vector<16x128xf32>, vector<128x128xf32>, vector<16x128xf32> -> vector<16x128xf32>
    %c0_3 = arith.constant 0 : index
    %c0_4 = arith.constant 0 : index
    %3 = vector.load %arg3[%c0_3, %c0_4] : memref<1x128xf32, #tpu.memory_space<vmem>>, vector<1x128xf32>
    %4 = vector.broadcast %3 : vector<1x128xf32> to vector<16x128xf32>
    %5 = arith.addf %2, %4 : vector<16x128xf32>
    %c0_5 = arith.constant 0 : index
    %c0_6 = arith.constant 0 : index
    %6 = vector.load %arg4[%c0_5, %c0_6] : memref<16x128xf32, #tpu.memory_space<vmem>>, vector<16x128xf32>
    tpu.vector_store %arg4[%c0_5, %c0_6], %5 {strides = array<i32>} : memref<16x128xf32, #tpu.memory_space<vmem>>, vector<16x128xf32>,
    return
  }
  func.func @transform_0(%arg0: i32) -> (i32, i32) {
    %c0_i32 = arith.constant 0 : i32
    %c0_i32_0 = arith.constant 0 : i32
    return %arg0, %c0_i32 : i32, i32
  }
  func.func @transform_1(%arg0: i32) -> (i32, i32) {
    %c0_i32 = arith.constant 0 : i32
    %c0_i32_0 = arith.constant 0 : i32
    %c0_i32_1 = arith.constant 0 : i32
    return %c0_i32, %c0_i32_0 : i32, i32
  }
  func.func @transform_2(%arg0: i32) -> (i32, i32) {
    %c0_i32 = arith.constant 0 : i32
    %c0_i32_0 = arith.constant 0 : i32
    %c0_i32_1 = arith.constant 0 : i32
    return %c0_i32, %c0_i32_0 : i32, i32
  }
  func.func @transform_3(%arg0: i32) -> (i32, i32) {
    %c0_i32 = arith.constant 0 : i32
    %c0_i32_0 = arith.constant 0 : i32
    return %arg0, %c0_i32 : i32, i32
  }
}

</mosaic_0001>

<bundles_post_ra>
// kernel: fc_backbone_forward.1
= control target key start
LH: loop header
LB: loop body
LE: loop exit
PB: predicated region body
PF: predicated region fallthrough
CT: control target
= control target key end

     0   :  { %8 = vsyncpa [#allocation3], 0  ;;  %s128_s15 = smov [#allocation2]   ;;  %s129_s17 = smov 128   ;;  %s169_s0 = inlined_call_operand.vmem [shape: f32[16,128], index: 0, kind: input, shape index: {}]   ;;  %s170_s1 = inlined_call_operand.hbm [shape: f32[128,128], index: 1, kind: input, shape index: {}]   ;;  %s171_s2 = inlined_call_operand.vmem [shape: f32[1,128], index: 2, kind: input, shape index: {}]   ;;  %s172_s3 = inlined_call_operand.vmem [shape: f32[16,128], index: 3, kind: output, shape index: {}]  }
   0x1   :  { %s15_s14 = sshll.u32 %s170_s1, 4  ;;  %s17_s16 = sshll.u32 %s128_s15, 4  ;;  %s16_s14 = int_to_ptr.hbm [resolvable:$true] %s15_s14  ;;  %s18_s16 = int_to_ptr.vmem [resolvable:$true] %s17_s16 }
   0x2   :  { %s130_s18 = smov 8  }
   0x3   :  { %23 = dma.hbm_to_vmem [thread:$0]  %s16_s14, 2048, %s18_s16, [#allocation3], %s129_s17, %s129_s17, %s130_s18  }
   0x4   :  { %126 = dma.done.wait [#allocation3], 2048  }
   0x5   :  { %127 = vsyncadd [#allocation3], 4294965248  ;;  %v47_v0 = vld [vmem:[#allocation2 + $0x78] sm:$0xff]  ;;  %v46_v1 = vld [vmem:[#allocation2 + $0x70] sm:$0xff] }
   0x6   :  { %52 = vmatpush.msra.mxu0 %v47_v0  ;;  %82 = vmatpush.msra.mxu1 %v47_v0  ;;  %v45_v2 = vld [vmem:[#allocation2 + $0x68] sm:$0xff]  ;;  %v44_v3 = vld [vmem:[#allocation2 + $0x60] sm:$0xff]  ;;  %v43_v4 = vld [vmem:[#allocation2 + $0x58] sm:$0xff] }
   0x7   :  { %v42_v5 = vld [vmem:[#allocation2 + $0x50] sm:$0xff]  ;;  %v41_v6 = vld [vmem:[#allocation2 + $0x48] sm:$0xff]  ;;  %v40_v7 = vld [vmem:[#allocation2 + $0x40] sm:$0xff] }
   0x8   :  { %53 = vmatpush.msra.mxu0 %v46_v1  ;;  %83 = vmatpush.msra.mxu1 %v46_v1  ;;  %v39_v8 = vld [vmem:[#allocation2 + $0x38] sm:$0xff]  ;;  %v38_v9 = vld [vmem:[#allocation2 + $0x30] sm:$0xff]  ;;  %v37_v10 = vld [vmem:[#allocation2 + $0x28] sm:$0xff] }
   0x9   :  { %v36_v11 = vld [vmem:[#allocation2 + $0x20] sm:$0xff]  ;;  %v35_v12 = vld [vmem:[#allocation2 + $0x18] sm:$0xff]  ;;  %v34_v13 = vld [vmem:[#allocation2 + $0x10] sm:$0xff] }
   0xa   :  { %54 = vmatpush.msra.mxu0 %v45_v2  ;;  %84 = vmatpush.msra.mxu1 %v45_v2  ;;  %v33_v14 = vld [vmem:[#allocation2 + $0x8] sm:$0xff]  ;;  %v32_v15 = vld [vmem:[#allocation2] sm:$0xff] }
   0xb   :  { %v30_v16 = vld [vmem:[%s169_s0] sm:$0xff]  ;;  %v31_v17 = vld [vmem:[%s169_s0 + $0x8] sm:$0xff] }
   0xc   :  { %55 = vmatpush.msra.mxu0 %v44_v3  ;;  %85 = vmatpush.msra.mxu1 %v44_v3  ;;  %v101_v18 = vld [vmem:[%s171_s2] ss:$0 sm:$0xff] }
   0xe   :  { %56 = vmatpush.msra.mxu0 %v43_v4  ;;  %86 = vmatpush.msra.mxu1 %v43_v4 }
  0x10   :  { %57 = vmatpush.msra.mxu0 %v42_v5  ;;  %87 = vmatpush.msra.mxu1 %v42_v5 }
  0x12   :  { %58 = vmatpush.msra.mxu0 %v41_v6  ;;  %88 = vmatpush.msra.mxu1 %v41_v6 }
  0x14   :  { %59 = vmatpush.msra.mxu0 %v40_v7  ;;  %89 = vmatpush.msra.mxu1 %v40_v7 }
  0x16   :  { %60 = vmatpush.msra.mxu0 %v39_v8  ;;  %90 = vmatpush.msra.mxu1 %v39_v8 }
  0x18   :  { %61 = vmatpush.msra.mxu0 %v38_v9  ;;  %91 = vmatpush.msra.mxu1 %v38_v9 }
  0x1a   :  { %62 = vmatpush.msra.mxu0 %v37_v10  ;;  %92 = vmatpush.msra.mxu1 %v37_v10 }
  0x1c   :  { %63 = vmatpush.msra.mxu0 %v36_v11  ;;  %93 = vmatpush.msra.mxu1 %v36_v11 }
  0x1e   :  { %64 = vmatpush.msra.mxu0 %v35_v12  ;;  %94 = vmatpush.msra.mxu1 %v35_v12 }
  0x20   :  { %65 = vmatpush.msra.mxu0 %v34_v13  ;;  %95 = vmatpush.msra.mxu1 %v34_v13 }
  0x22   :  { %66 = vmatpush.msra.mxu0 %v33_v14  ;;  %96 = vmatpush.msra.mxu1 %v33_v14 }
  0x24   :  { %67 = vmatpush.msra.mxu0 %v32_v15  ;;  %97 = vmatpush.msra.mxu1 %v32_v15 }
  0x25   :  { %68 = vmatmul.f32.vlgmr.msra.gmra.mxu0 %v30_v16  ;;  %71 = vmatmul.f32.vlgmr.msra.gmra.mxu1 %v31_v17 }
  0xa2   :  { %v69_v19 = vpop.f32.mrf.mxu0  ;;  %v72_v20 = vpop.f32.mrf.mxu1 }
  0xa3   :  { %v70_v21 = vadd.f32 %v101_v18, %v69_v19  ;;  %v73_v22 = vadd.f32 %v101_v18, %v72_v20 }
  0xa5   :  { %75 = vst [vmem:[%s172_s3] sm:$0xff] %v70_v21 }
  0xa6   :  { %76 = vst [vmem:[%s172_s3 + $0x8] sm:$0xff] %v73_v22 }
  0xa7   :  { %81 = vsyncpa [#allocation3], 1 }

</bundles_post_ra>
